<compile_context>
chip_gen: v7x
topology: tpu7x:2x2x1
jax: 0.10.0
libtpu: 0.0.40
codegen_flags: <defaults>
</compile_context>

<pallas_src>
import jax
import jax.numpy as jnp
from jax.experimental import pallas as pl
from jax.experimental.pallas import tpu as pltpu

INPUT_SIZE = 64
HIDDEN_SIZES = [128, 64]
NUM_CLASSES = 3
OUT_PAD = 8  # classifier width padded to the sublane-friendly minimum (8)


def _round_up(n, m):
    return ((n + m - 1) // m) * m


def mlp_kernel(x_ref, w1_ref, b1_ref, w2_ref, b2_ref, w3_ref, b3_ref, o_ref):
    # Cast x to bf16 in-kernel (MXU operand dtype); accumulation stays f32.
    x = x_ref[...].astype(jnp.bfloat16)
    # Layer 1: Linear(64 -> 128) + ReLU   (Dropout = identity at inference)
    h1 = jnp.dot(x, w1_ref[...], preferred_element_type=jnp.float32)
    h1 = jnp.maximum(h1 + b1_ref[...], 0.0)
    # Layer 2: Linear(128 -> 64) + ReLU
    h2 = jnp.dot(h1.astype(jnp.bfloat16), w2_ref[...],
                 preferred_element_type=jnp.float32)
    h2 = jnp.maximum(h2 + b2_ref[...], 0.0)
    # Classifier: Linear(64 -> 3), zero-padded to 8 output columns.
    out = jnp.dot(h2.astype(jnp.bfloat16), w3_ref[...],
                  preferred_element_type=jnp.float32)
    o_ref[...] = (out + b3_ref[...]).astype(o_ref.dtype)


def game_state_utility_mlp(x, params, *, bm=1024):
    """x: [B, 64] float32.  params: dict of w1,b1,w2,b2,w3,b3 ([in,out]/[1,out])."""
    B, D = x.shape
    assert D == INPUT_SIZE

    # Pick an effective batch tile with bounded padding waste:
    #   num_tiles = ceil(B / bm); bm_eff = round_up(ceil(B / num_tiles), 8).
    num_tiles = pl.cdiv(B, bm)
    bm_eff = min(_round_up(pl.cdiv(B, num_tiles), 8), _round_up(bm, 8))
    B_pad = num_tiles * bm_eff
    if B_pad != B:
        x = jnp.pad(x, ((0, B_pad - B), (0, 0)))
    x = x.astype(jnp.float32)  # kernel casts to bf16 internally

    # bf16 matmul operands (f32 accumulation in-kernel); biases stay f32.
    w1 = params["w1"].astype(jnp.bfloat16)
    w2 = params["w2"].astype(jnp.bfloat16)
    b1 = params["b1"].astype(jnp.float32)
    b2 = params["b2"].astype(jnp.float32)
    # Pad classifier to 8 output columns (zeros beyond NUM_CLASSES).
    w3 = jnp.pad(params["w3"],
                 ((0, 0), (0, OUT_PAD - NUM_CLASSES))).astype(jnp.bfloat16)
    b3 = jnp.pad(params["b3"],
                 ((0, 0), (0, OUT_PAD - NUM_CLASSES))).astype(jnp.float32)

    grid = (num_tiles,)
    # Weights/biases are tiny; constant index_map keeps them VMEM-resident.
    full = lambda arr: pl.BlockSpec(arr.shape, lambda i: (0, 0))

    h1_sz, h2_sz = HIDDEN_SIZES
    flops = 2 * B_pad * (INPUT_SIZE * h1_sz + h1_sz * h2_sz + h2_sz * OUT_PAD)
    weight_bytes = (w1.size * 2 + b1.size * 4 + w2.size * 2 + b2.size * 4
                    + w3.size * 2 + b3.size * 4)
    bytes_accessed = B_pad * (INPUT_SIZE * 4 + OUT_PAD * 4) + weight_bytes

    out = pl.pallas_call(
        mlp_kernel,
        out_shape=jax.ShapeDtypeStruct((B_pad, OUT_PAD), jnp.float32),
        grid=grid,
        in_specs=[
            pl.BlockSpec((bm_eff, INPUT_SIZE), lambda i: (i, 0)),  # x tile
            full(w1), full(b1),
            full(w2), full(b2),
            full(w3), full(b3),
        ],
        out_specs=pl.BlockSpec((bm_eff, OUT_PAD), lambda i: (i, 0)),
        compiler_params=pltpu.CompilerParams(
            dimension_semantics=("parallel",)),
        cost_estimate=pl.CostEstimate(flops=flops, transcendentals=0,
                                      bytes_accessed=bytes_accessed),
    )(x, w1, b1, w2, b2, w3, b3)

    return out[:B, :NUM_CLASSES]


def init_params(key):
    """Deterministic parameter init (PyTorch-Linear-like uniform fan-in)."""
    sizes = [INPUT_SIZE] + HIDDEN_SIZES + [NUM_CLASSES]
    params = {}
    keys = jax.random.split(key, 2 * (len(sizes) - 1))
    for li, (fan_in, fan_out) in enumerate(zip(sizes[:-1], sizes[1:]), start=1):
        bound = 1.0 / (fan_in ** 0.5)
        kw, kb = keys[2 * (li - 1)], keys[2 * (li - 1) + 1]
        params[f"w{li}"] = jax.random.uniform(
            kw, (fan_in, fan_out), jnp.float32, -bound, bound)
        params[f"b{li}"] = jax.random.uniform(
            kb, (1, fan_out), jnp.float32, -bound, bound)
    return params


def mlp_reference_bf16(x, params):
    """Reference mimicking the kernel's dtype path (bf16 matmul, f32 accum)."""
    h1 = jnp.dot(x.astype(jnp.bfloat16), params["w1"].astype(jnp.bfloat16),
                 preferred_element_type=jnp.float32) + params["b1"]
    h1 = jnp.maximum(h1, 0.0)
    h2 = jnp.dot(h1.astype(jnp.bfloat16), params["w2"].astype(jnp.bfloat16),
                 preferred_element_type=jnp.float32) + params["b2"]
    h2 = jnp.maximum(h2, 0.0)
    return jnp.dot(h2.astype(jnp.bfloat16), params["w3"].astype(jnp.bfloat16),
                   preferred_element_type=jnp.float32) + params["b3"]


def mlp_reference_f32(x, params):
    h1 = jnp.maximum(x @ params["w1"] + params["b1"], 0.0)
    h2 = jnp.maximum(h1 @ params["w2"] + params["b2"], 0.0)
    return h2 @ params["w3"] + params["b3"]


if __name__ == "__main__":
    key = jax.random.PRNGKey(0)
    kp, kx = jax.random.split(key)
    params = init_params(kp)

    B = 8
    # Binary game-state vectors, like the original module's input.
    x = jax.random.bernoulli(kx, 0.5, (B, INPUT_SIZE)).astype(jnp.float32)

    out = game_state_utility_mlp(x, params)
    out = jax.block_until_ready(out)
    assert out.shape == (B, NUM_CLASSES)

    # Tight check against a reference with the same bf16-operand / f32-accum path.
    ref_bf16 = mlp_reference_bf16(x, params)
    assert jnp.allclose(out, ref_bf16, atol=1e-3, rtol=1e-3)
    # Loose semantic check against the pure-f32 PyTorch-equivalent forward.
    ref_f32 = mlp_reference_f32(x, params)
    assert jnp.allclose(out, ref_f32, atol=5e-2, rtol=5e-2)

    print("KERNEL_OK")
</pallas_src>

<mosaic_0001>
module attributes {stable_mosaic.version = 11 : i64} {
  func.func @mlp_kernel(%arg0: i32, %arg1: memref<8x64xf32, #tpu.memory_space<vmem>>, %arg2: memref<64x128xbf16, #tpu.memory_space<vmem>>, %arg3: memref<1x128xf32, #tpu.memory_space<vmem>>, %arg4: memref<128x64xbf16, #tpu.memory_space<vmem>>, %arg5: memref<1x64xf32, #tpu.memory_space<vmem>>, %arg6: memref<64x8xbf16, #tpu.memory_space<vmem>>, %arg7: memref<1x8xf32, #tpu.memory_space<vmem>>, %arg8: memref<8x8xf32, #tpu.memory_space<vmem>>) attributes {dimension_semantics = [#tpu.dimension_semantics<parallel>], iteration_bounds = array<i64: 1>, scalar_prefetch = 0 : i64, scratch_operands = 0 : i64, tpu.core_type = #tpu.core_type<tc>, window_params = [{transform_indices = @transform_0, window_bounds = array<i64: 8, 64>}, {pipeline_mode = #tpu.pipeline_mode<synchronous>, transform_indices = @transform_1, window_bounds = array<i64: 64, 128>}, {pipeline_mode = #tpu.pipeline_mode<synchronous>, transform_indices = @transform_2, window_bounds = array<i64: 1, 128>}, {pipeline_mode = #tpu.pipeline_mode<synchronous>, transform_indices = @transform_3, window_bounds = array<i64: 128, 64>}, {pipeline_mode = #tpu.pipeline_mode<synchronous>, transform_indices = @transform_4, window_bounds = array<i64: 1, 64>}, {pipeline_mode = #tpu.pipeline_mode<synchronous>, transform_indices = @transform_5, window_bounds = array<i64: 64, 8>}, {pipeline_mode = #tpu.pipeline_mode<synchronous>, transform_indices = @transform_6, window_bounds = array<i64: 1, 8>}, {transform_indices = @transform_7, window_bounds = array<i64: 8, 8>}]} {
    %c0 = arith.constant 0 : index
    %c0_0 = arith.constant 0 : index
    %0 = vector.load %arg1[%c0, %c0_0] : memref<8x64xf32, #tpu.memory_space<vmem>>, vector<8x64xf32>
    %1 = arith.truncf %0 : vector<8x64xf32> to vector<8x64xbf16>
    %c0_1 = arith.constant 0 : index
    %c0_2 = arith.constant 0 : index
    %2 = vector.load %arg2[%c0_1, %c0_2] : memref<64x128xbf16, #tpu.memory_space<vmem>>, vector<64x128xbf16>
    %cst = arith.constant dense<0.000000e+00> : vector<8x128xf32>
    %3 = tpu.matmul %1, %2, %cst {dimension_numbers = #tpu.dot_dimension_numbers<[1], [0], [0], [1], [0, 0, 1, 1], [], []>} : vector<8x64xbf16>, vector<64x128xbf16>, vector<8x128xf32> -> vector<8x128xf32>
    %c0_3 = arith.constant 0 : index
    %c0_4 = arith.constant 0 : index
    %4 = vector.load %arg3[%c0_3, %c0_4] : memref<1x128xf32, #tpu.memory_space<vmem>>, vector<1x128xf32>
    %5 = vector.broadcast %4 : vector<1x128xf32> to vector<8x128xf32>
    %6 = arith.addf %3, %5 : vector<8x128xf32>
    %cst_5 = arith.constant 0.000000e+00 : f32
    %7 = vector.broadcast %cst_5 : f32 to vector<8x128xf32>
    %8 = arith.maximumf %6, %7 : vector<8x128xf32>
    %9 = arith.truncf %8 : vector<8x128xf32> to vector<8x128xbf16>
    %c0_6 = arith.constant 0 : index
    %c0_7 = arith.constant 0 : index
    %10 = vector.load %arg4[%c0_6, %c0_7] : memref<128x64xbf16, #tpu.memory_space<vmem>>, vector<128x64xbf16>
    %cst_8 = arith.constant dense<0.000000e+00> : vector<8x64xf32>
    %11 = tpu.matmul %9, %10, %cst_8 {dimension_numbers = #tpu.dot_dimension_numbers<[1], [0], [0], [1], [0, 0, 1, 1], [], []>} : vector<8x128xbf16>, vector<128x64xbf16>, vector<8x64xf32> -> vector<8x64xf32>
    %c0_9 = arith.constant 0 : index
    %c0_10 = arith.constant 0 : index
    %12 = vector.load %arg5[%c0_9, %c0_10] : memref<1x64xf32, #tpu.memory_space<vmem>>, vector<1x64xf32>
    %13 = vector.broadcast %12 : vector<1x64xf32> to vector<8x64xf32>
    %14 = arith.addf %11, %13 : vector<8x64xf32>
    %cst_11 = arith.constant 0.000000e+00 : f32
    %15 = vector.broadcast %cst_11 : f32 to vector<8x64xf32>
    %16 = arith.maximumf %14, %15 : vector<8x64xf32>
    %17 = arith.truncf %16 : vector<8x64xf32> to vector<8x64xbf16>
    %c0_12 = arith.constant 0 : index
    %c0_13 = arith.constant 0 : index
    %18 = vector.load %arg6[%c0_12, %c0_13] : memref<64x8xbf16, #tpu.memory_space<vmem>>, vector<64x8xbf16>
    %cst_14 = arith.constant dense<0.000000e+00> : vector<8x8xf32>
    %19 = tpu.matmul %17, %18, %cst_14 {dimension_numbers = #tpu.dot_dimension_numbers<[1], [0], [0], [1], [0, 0, 1, 1], [], []>} : vector<8x64xbf16>, vector<64x8xbf16>, vector<8x8xf32> -> vector<8x8xf32>
    %c0_15 = arith.constant 0 : index
    %c0_16 = arith.constant 0 : index
    %20 = vector.load %arg7[%c0_15, %c0_16] : memref<1x8xf32, #tpu.memory_space<vmem>>, vector<1x8xf32>
    %21 = vector.broadcast %20 : vector<1x8xf32> to vector<8x8xf32>
    %22 = arith.addf %19, %21 : vector<8x8xf32>
    %c0_17 = arith.constant 0 : index
    %c0_18 = arith.constant 0 : index
    %23 = vector.load %arg8[%c0_17, %c0_18] : memref<8x8xf32, #tpu.memory_space<vmem>>, vector<8x8xf32>
    tpu.vector_store %arg8[%c0_17, %c0_18], %22 {strides = array<i32>} : memref<8x8xf32, #tpu.memory_space<vmem>>, vector<8x8xf32>,
    return
  }
  func.func @transform_0(%arg0: i32) -> (i32, i32) {
    %c0_i32 = arith.constant 0 : i32
    %c0_i32_0 = arith.constant 0 : i32
    return %arg0, %c0_i32 : i32, i32
  }
  func.func @transform_1(%arg0: i32) -> (i32, i32) {
    %c0_i32 = arith.constant 0 : i32
    %c0_i32_0 = arith.constant 0 : i32
    %c0_i32_1 = arith.constant 0 : i32
    return %c0_i32, %c0_i32_0 : i32, i32
  }
  func.func @transform_2(%arg0: i32) -> (i32, i32) {
    %c0_i32 = arith.constant 0 : i32
    %c0_i32_0 = arith.constant 0 : i32
    %c0_i32_1 = arith.constant 0 : i32
    return %c0_i32, %c0_i32_0 : i32, i32
  }
  func.func @transform_3(%arg0: i32) -> (i32, i32) {
    %c0_i32 = arith.constant 0 : i32
    %c0_i32_0 = arith.constant 0 : i32
    %c0_i32_1 = arith.constant 0 : i32
    return %c0_i32, %c0_i32_0 : i32, i32
  }
  func.func @transform_4(%arg0: i32) -> (i32, i32) {
    %c0_i32 = arith.constant 0 : i32
    %c0_i32_0 = arith.constant 0 : i32
    %c0_i32_1 = arith.constant 0 : i32
    return %c0_i32, %c0_i32_0 : i32, i32
  }
  func.func @transform_5(%arg0: i32) -> (i32, i32) {
    %c0_i32 = arith.constant 0 : i32
    %c0_i32_0 = arith.constant 0 : i32
    %c0_i32_1 = arith.constant 0 : i32
    return %c0_i32, %c0_i32_0 : i32, i32
  }
  func.func @transform_6(%arg0: i32) -> (i32, i32) {
    %c0_i32 = arith.constant 0 : i32
    %c0_i32_0 = arith.constant 0 : i32
    %c0_i32_1 = arith.constant 0 : i32
    return %c0_i32, %c0_i32_0 : i32, i32
  }
  func.func @transform_7(%arg0: i32) -> (i32, i32) {
    %c0_i32 = arith.constant 0 : i32
    %c0_i32_0 = arith.constant 0 : i32
    return %arg0, %c0_i32 : i32, i32
  }
}

</mosaic_0001>

<bundles_post_ra>
// kernel: tpu_custom_call.1
= control target key start
LH: loop header
LB: loop body
LE: loop exit
PB: predicated region body
PF: predicated region fallthrough
CT: control target
= control target key end

     0   :  { %v453_v1 = vmov 0.0   ;;  %vm454_vm0 = vmmov 0   ;;  %vm69_vm1 = vcmask 523264   ;;  %s573_s0 = inlined_call_operand.vmem [shape: f32[8,64], index: 0, kind: input, shape index: {}]   ;;  %s574_s1 = inlined_call_operand.vmem [shape: bf16[64,128], index: 1, kind: input, shape index: {}]   ;;  %s575_s2 = inlined_call_operand.vmem [shape: f32[1,128], index: 2, kind: input, shape index: {}]   ;;  %s576_s3 = inlined_call_operand.vmem [shape: bf16[128,64], index: 3, kind: input, shape index: {}]   ;;  %s577_s4 = inlined_call_operand.vmem [shape: f32[1,64], index: 4, kind: input, shape index: {}]   ;;  %s578_s5 = inlined_call_operand.vmem [shape: bf16[64,8], index: 5, kind: input, shape index: {}]   ;;  %s579_s6 = inlined_call_operand.vmem [shape: f32[1,8], index: 6, kind: input, shape index: {}]   ;;  %s580_s7 = inlined_call_operand.hbm [shape: f32[8,8], index: 7, kind: output, shape index: {}]  }
   0x1   :  { %v413_v0 = vld [vmem:[%s574_s1] sm:$0xff]   ;;  %366 = vmatprep.subr.bf16.mxu0 %v453_v1  ;;  %378 = vmatprep.subr.bf16.mxu1 %v453_v1  ;;  %v414_v2 = vld [vmem:[%s574_s1 + $0x8] sm:$0xff]   ;;  %v415_v4 = vld [vmem:[%s574_s1 + $0x10] sm:$0xff]  }
   0x2   :  { %367 = vmatpush3.bf16.msra.mxu0 %v413_v0  ;;  %374 = vmatprep.mubr.msk.bf16.mxu0 %vm454_vm0, %v453_v1  ;;  %v417_v3 = vld [vmem:[%s576_s3] sm:$0xff]   ;;  %v418_v5 = vld [vmem:[%s576_s3 + $0x8] sm:$0xff]   ;;  %v416_v6 = vld [vmem:[%s574_s1 + $0x18] sm:$0xff]  }
   0x3   :  { %368 = vmatprep.subr.bf16.mxu0 %v453_v1  ;;  %394 = vmatprep.mubr.msk.bf16.mxu1 %vm454_vm0, %v453_v1  ;;  %v28_v7 = vld [vmem:[%s573_s0] sm:$0xff]  ;;  %v419_v8 = vld [vmem:[%s576_s3 + $0x10] sm:$0xff]  }
   0x4   :  { %379 = vmatpush3.bf16.msra.mxu1 %v417_v3  ;;  %v29_v9 = vpack.c.bf16 %v28_v7, %v28_v7 }
   0x5   :  { %380 = vmatprep.subr.bf16.mxu1 %v453_v1 }
   0x6   :  { %369 = vmatpush3.bf16.msra.mxu0 %v414_v2 }
   0x7   :  { %370 = vmatprep.subr.bf16.mxu0 %v453_v1 }
   0x8   :  { %381 = vmatpush3.bf16.msra.mxu1 %v418_v5 }
   0x9   :  { %382 = vmatprep.subr.bf16.mxu1 %v453_v1 }
   0xa   :  { %371 = vmatpush3.bf16.msra.mxu0 %v415_v4 }
   0xb   :  { %372 = vmatprep.subr.bf16.mxu0 %v453_v1 }
   0xe   :  { %373 = vmatpush3.bf16.msra.mxu0 %v416_v6 }
   0xf   :  { %12 = vsyncpa [#allocation3], 0  ;;  %383 = vmatpush3.bf16.msra.mxu1 %v419_v8  ;;  %v420_v10 = vld [vmem:[%s576_s3 + $0x18] sm:$0xff]   ;;  %398 = vmatprep.subr.bf16.mxu0 %v453_v1  ;;  %v421_v11 = vld [vmem:[%s576_s3 + $0x20] sm:$0xff]   ;;  %s455_s14 = smov [#allocation2]   ;;  %vm310_vm2 = vcmask 64512  }
  0x10   :  { %384 = vmatprep.subr.bf16.mxu1 %v453_v1  ;;  %v422_v12 = vld [vmem:[%s576_s3 + $0x28] sm:$0xff]   ;;  %v423_v13 = vld [vmem:[%s576_s3 + $0x30] sm:$0xff]   ;;  %v424_v14 = vld [vmem:[%s576_s3 + $0x38] sm:$0xff]  }
  0x11   :  { %375 = vmatmul.mubr.msk.bf16.vlgmr.msra.gmra.mrb[0].mxu0 %vm69_vm1, %v29_v9  ;;  %v425_v15 = vld [vmem:[%s578_s5] sm:$0xff]   ;;  %v426_v16 = vld [vmem:[%s578_s5 + $0x8] sm:$0xff]   ;;  %v427_v25 = vld [vmem:[%s578_s5 + $0x10] sm:$0xff]  }
  0x12   :  { %406 = vmatprep.mubr.msk.bf16.mxu0 %vm454_vm0, %v453_v1  ;;  %399 = vmatpush3.bf16.msra.mxu0 %v425_v15  ;;  %v326_v17 = vld [vmem:[%s575_s2] ss:$0 sm:$0xff]  ;;  %v428_v26 = vld [vmem:[%s578_s5 + $0x18] sm:$0xff]   ;;  %s318_s5 = sshll.u32 %s455_s14, 4  ;;  %s319_s5 = int_to_ptr.vmem [resolvable:$true] %s318_s5 }
  0x13   :  { %385 = vmatpush3.bf16.msra.mxu1 %v420_v10  ;;  %400 = vmatprep.subr.bf16.mxu0 %v453_v1  ;;  %v332_v27 = vld [vmem:[%s577_s4] ss:$0 sm:$0xff]  ;;  %s429_s4 = scalar_lea.vmem %s319_s5, 128  ;;  %p434_p1 = scmp.lt.s32.totalorder %s319_s5, %s319_s5 }
  0x14   :  { %386 = vmatprep.subr.bf16.mxu1 %v453_v1  ;;  %v341_v35 = vld [vmem:[%s579_s6] ss:$0 sm:$0xff]  ;;  %p430_p0 = scmp.ne.s32.totalorder %s319_s5, %s429_s4  ;;  %p435_p2 = scmp.lt.s32.totalorder %s429_s4, %s429_s4 }
  0x16   :  { %401 = vmatpush3.bf16.msra.mxu0 %v426_v16  ;;  %p436_p3 = por %p435_p2, %p434_p1 }
  0x17   :  { %387 = vmatpush3.bf16.msra.mxu1 %v421_v11  ;;  %402 = vmatprep.subr.bf16.mxu0 %v453_v1 }
  0x18   :  { %388 = vmatprep.subr.bf16.mxu1 %v453_v1  ;;  %p437_p4 = pnand %p436_p3, %p430_p0 }
  0x1a   :  { %403 = vmatpush3.bf16.msra.mxu0 %v427_v25 }
  0x1b   :  { %389 = vmatpush3.bf16.msra.mxu1 %v422_v12  ;;  %404 = vmatprep.subr.bf16.mxu0 %v453_v1 }
  0x1c   :  { %390 = vmatprep.subr.bf16.mxu1 %v453_v1 }
  0x1e   :  { %405 = vmatpush3.bf16.msra.mxu0 %v428_v26 }
  0x1f   :  { %391 = vmatpush3.bf16.msra.mxu1 %v423_v13 }
  0x20   :  { %392 = vmatprep.subr.bf16.mxu1 %v453_v1 }
  0x23   :  { %393 = vmatpush3.bf16.msra.mxu1 %v424_v14 }
  0xe4   :  { %v107_v18 = vpop.f32.mrb[0].mxu0 }
  0xe5   :  { %v108_v19 = vadd.f32 %v326_v17, %v107_v18  ;;  %v376_v20 = vpop.f32.mrb[1].mxu0 }
  0xe6   :  { %v110_v21 = vpop.f32.mrb[2].mxu0 }
  0xe7   :  { %v113_v22 = vmax.f32 %v108_v19, 0.0  ;;  %v377_v23 = vpop.f32.mrb[3].mxu0 }
  0xe9   :  { %v114_v24 = vpack.c.bf16 %v113_v22, %v113_v22 }
  0xeb   :  { %395 = vmatmul.mubr.bf16.vlgmr.msra.gmra.mrb[0].mxu1 %v114_v24 }
 0x1be   :  { %v220_v28 = vpop.f32.mrb[0].mxu1 }
 0x1bf   :  { %v221_v29 = vadd.f32 %v332_v27, %v220_v28  ;;  %v396_v30 = vpop.f32.mrb[1].mxu1 }
 0x1c0   :  { %v223_v31 = vpop.f32.mrb[2].mxu1 }
 0x1c1   :  { %v226_v32 = vmax.f32 %v221_v29, 0.0  ;;  %v397_v33 = vpop.f32.mrb[3].mxu1 }
 0x1c3   :  { %v227_v34 = vpack.c.bf16 %v226_v32, %v226_v32 }
 0x1c5   :  { %407 = vmatmul.mubr.msk.bf16.vlgmr.msra.gmra.mrb[4].mxu0 %vm69_vm1, %v227_v34 }
 0x298   :  { %v304_v36 = vpop.f32.mrb[4].mxu0 }
 0x299   :  { %v305_v37 = vadd.f32 %v341_v35, %v304_v36  ;;  %v408_v38 = vpop.f32.mrb[5].mxu0 }
 0x29a   :  { %v307_v39 = vpop.f32.mrb[6].mxu0 }
 0x29b   :  { %v409_v40 = vpop.f32.mrb[7].mxu0  ;;  %311 = vst.msk [vmem:[#allocation2] sm:$0xff] %vm310_vm2, %v305_v37 }
 0x29c   :  { %440 = shalt.err (!%p437_p4)
}
 0x29d   :  { %s441_s6 = scalar_lea.hbm %s580_s7, 128 }
 0x29e   :  { %p442_p5 = scmp.ne.s32.totalorder %s580_s7, %s441_s6  ;;  %p445_p6 = scmp.lt.u32.totalorder %s441_s6, %s580_s7 }
 0x2a0   :  { %p447_p7 = pnand %p445_p6, %p442_p5 }
 0x2a2   :  { %450 = shalt.err (!%p447_p7)
}
 0x2a3   :  { %321 = dma.vmem_to_hbm [thread:$0]  %s319_s5, 128, %s580_s7, [#allocation3]  }
 0x2a4   :  { %451 = dma.done.wait [#allocation3], 128  }
 0x2a5   :  { %452 = vsyncadd [#allocation3], 4294967168 }
 0x2a6   :  { %325 = vsyncpa [#allocation3], 1 }

</bundles_post_ra>
